<compile_context>
chip_gen: v6e
topology: v6e:2x2x1
jax: 0.10.0
libtpu: 0.0.40
codegen_flags: <defaults>
</compile_context>

<pallas_src>
import functools

import jax
import jax.numpy as jnp
from jax.experimental import pallas as pl
from jax.experimental.pallas import tpu as pltpu


# ----------------------------------------------------------------------------
# Fused encode + model + per-sample MSE kernel.
# Grid = (n, k): n tiles the output/feature dim of pred ("parallel"), k tiles
# the reduction dim ("arbitrary", innermost -> reduction axis last).
# ----------------------------------------------------------------------------
def _fused_fm_kernel(t_ref, x_k_ref, eps_k_ref, x_n_ref, eps_n_ref,
                     w_ref, tb_ref, pred_ref, vpart_ref, *, sigma_min):
    k = pl.program_id(1)
    one_m_sig = 1.0 - sigma_min

    @pl.when(k == 0)
    def _():
        # pred output block is resident across the k axis -> use it as the
        # f32 accumulator directly (no VMEM scratch needed).
        pred_ref[...] = jnp.zeros_like(pred_ref)

    t = t_ref[...]                                              # (B, 1) f32
    # --- fused encode (f32 elementwise; free under the matmul) -------------
    xt = (1.0 - one_m_sig * t) * x_k_ref[...] + t * eps_k_ref[...]
    # --- MXU: bf16 operands, f32 accumulation -------------------------------
    pred_ref[...] += jnp.dot(xt.astype(jnp.bfloat16), w_ref[...],
                             preferred_element_type=jnp.float32)

    @pl.when(k == pl.num_programs(1) - 1)
    def _():
        pred = pred_ref[...] + t * tb_ref[...]                  # (B, tn) f32
        pred_ref[...] = pred                                    # lane-dense store
        # --- fused per-sample MSE partial for this N tile -------------------
        target = eps_n_ref[...] - one_m_sig * x_n_ref[...]
        diff = pred - target
        sse = jnp.sum(diff * diff, axis=-1, keepdims=True)      # (B, 1)
        vpart_ref[...] = sse[None, :, :]                        # (1, B, 1)


def _pick_tile(d, preferred):
    for t in (preferred, 1024, 512, 256, 128):
        if t <= d and d % t == 0:
            return t
    # Tail not divisible by 128: fall back to one full-width block.
    return d


def pallas_flow_matching_step(t2, x, eps, w_bf16, tb, sigma_min,
                              tn=512, tk=512):
    """Returns (pred (B,D) f32, val (B,) per-sample feature-mean MSE)."""
    B, D = x.shape
    tn = _pick_tile(D, tn)
    tk = _pick_tile(D, tk)
    n_tiles = D // tn
    k_tiles = D // tk

    # Advisory cost hint for XLA scheduling around the custom call.
    cost = pl.CostEstimate(
        flops=2 * B * D * D + 8 * B * D,
        transcendentals=0,
        bytes_accessed=(D * D * 2            # W (bf16)
                        + 2 * 2 * B * D * 4  # x, eps read twice (encode/target)
                        + B * D * 4          # pred write
                        + D * 4))            # time bias

    kernel = functools.partial(_fused_fm_kernel, sigma_min=float(sigma_min))
    pred, vpart = pl.pallas_call(
        kernel,
        out_shape=(
            jax.ShapeDtypeStruct((B, D), jnp.float32),           # pred
            jax.ShapeDtypeStruct((n_tiles, B, 1), jnp.float32),  # SSE partials
        ),
        grid_spec=pltpu.PrefetchScalarGridSpec(
            num_scalar_prefetch=0,
            grid=(n_tiles, k_tiles),
            in_specs=[
                pl.BlockSpec((B, 1), lambda n, k: (0, 0)),        # t
                pl.BlockSpec((B, tk), lambda n, k: (0, k)),       # x   (encode)
                pl.BlockSpec((B, tk), lambda n, k: (0, k)),       # eps (encode)
                pl.BlockSpec((B, tn), lambda n, k: (0, n)),       # x   (target)
                pl.BlockSpec((B, tn), lambda n, k: (0, n)),       # eps (target)
                pl.BlockSpec((tk, tn), lambda n, k: (k, n)),      # W   (bf16)
                pl.BlockSpec((1, tn), lambda n, k: (0, n)),       # time bias
            ],
            out_specs=(
                pl.BlockSpec((B, tn), lambda n, k: (0, n)),       # pred
                pl.BlockSpec((1, B, 1), lambda n, k: (n, 0, 0)),  # partials
            ),
        ),
        compiler_params=pltpu.CompilerParams(
            dimension_semantics=("parallel", "arbitrary")),
        cost_estimate=cost,
    )(t2, x, eps, x, eps, w_bf16, tb)

    # Tiny epilogue: reduce per-N partial SSEs -> per-sample mean over features.
    val = jnp.sum(vpart[:, :, 0], axis=0) / float(D)              # (B,)
    return pred, val


# ----------------------------------------------------------------------------
# FlowMatching.forward (learn_logvar=False, loss_mask=None)
# ----------------------------------------------------------------------------
def flow_matching_forward(model_params, x_nchw, key, sigma_min=0.0):
    B = x_nchw.shape[0]
    xf = x_nchw.reshape(B, -1).astype(jnp.float32)

    k_t, k_eps = jax.random.split(key)
    # timestep_sampling == 'linear'  -> t ~ U[0, 1)
    t = jax.random.uniform(k_t, (B,), dtype=jnp.float32)
    # noise_prior == 'independent'   -> eps ~ N(0, 1)
    eps = jax.random.normal(k_eps, xf.shape, dtype=jnp.float32)

    t2 = t.reshape(B, 1)
    pred, val = pallas_flow_matching_step(
        t2, xf, eps, model_params["w"], model_params["tb"], sigma_min)

    logvar_t = jnp.zeros_like(val)           # learn_logvar = False
    loss = jnp.mean(val / jnp.exp(logvar_t) + logvar_t)

    loss_dict = {"fm_loss": loss}
    data_dict = {"eps": eps}
    return loss, loss_dict, data_dict, (t, eps, pred, val)


# ----------------------------------------------------------------------------
# Pure-JAX reference (mirrors the PyTorch semantics; matmul also uses bf16
# operands with f32 accumulation so precision matches the kernel).
# ----------------------------------------------------------------------------
def reference_forward(model_params, x_nchw, t, eps, sigma_min=0.0):
    B = x_nchw.shape[0]
    xf = x_nchw.reshape(B, -1).astype(jnp.float32)
    t2 = t.reshape(B, 1)
    xt = (1.0 - (1.0 - sigma_min) * t2) * xf + t2 * eps
    pred = jnp.dot(xt.astype(jnp.bfloat16), model_params["w"],
                   preferred_element_type=jnp.float32) + t2 * model_params["tb"]
    target = eps - (1.0 - sigma_min) * xf
    val = jnp.mean((pred - target) ** 2, axis=1)
    logvar_t = jnp.zeros_like(val)
    loss = jnp.mean(val / jnp.exp(logvar_t) + logvar_t)
    return loss, pred, val


if __name__ == "__main__":
    # Small shapes consistent with the module: NCHW image batch.
    # (Note: for real workloads use B >= 8 -- ideally 128+ -- so the MXU rows
    #  and vreg sublanes are actually filled; the kernel supports any B.)
    B, C, H, W = 2, 4, 16, 16
    D = C * H * W                      # 1024
    sigma_min = 0.0

    key = jax.random.PRNGKey(0)
    k_x, k_w, k_tb, k_fwd = jax.random.split(key, 4)

    x = jax.random.normal(k_x, (B, C, H, W), dtype=jnp.float32)

    # Deterministic synthetic model params (stand-in for the external `model`).
    # W stored in bf16 (halves its HBM traffic; it feeds the MXU directly).
    model_params = {
        "w": (jax.random.normal(k_w, (D, D), dtype=jnp.float32) * 0.02
              ).astype(jnp.bfloat16),
        "tb": jax.random.normal(k_tb, (1, D), dtype=jnp.float32) * 0.1,
    }

    loss, loss_dict, data_dict, (t, eps, pred, val) = \
        flow_matching_forward(model_params, x, k_fwd, sigma_min=sigma_min)
    jax.block_until_ready(loss)

    # Correctness check against the pure-JAX reference (same t / eps).
    ref_loss, ref_pred, ref_val = reference_forward(
        model_params, x, t, eps, sigma_min=sigma_min)

    assert jnp.allclose(pred, ref_pred, atol=1e-3, rtol=1e-3)
    assert jnp.allclose(val, ref_val, atol=1e-3, rtol=1e-3)
    assert jnp.allclose(loss, ref_loss, atol=1e-3, rtol=1e-3)

    # TODO(synk): sample_euler / sample (inference loop over an external model)
    # is host-side control flow around repeated model calls; not a kernel.
    print("KERNEL_OK")
</pallas_src>

<mosaic_0001>
module attributes {stable_mosaic.version = 11 : i64} {
  func.func @_fused_fm_kernel(%arg0: i32, %arg1: i32, %arg2: memref<2x1xf32, #tpu.memory_space<vmem>>, %arg3: memref<2x512xf32, #tpu.memory_space<vmem>>, %arg4: memref<2x512xf32, #tpu.memory_space<vmem>>, %arg5: memref<2x512xf32, #tpu.memory_space<vmem>>, %arg6: memref<2x512xf32, #tpu.memory_space<vmem>>, %arg7: memref<512x512xbf16, #tpu.memory_space<vmem>>, %arg8: memref<1x512xf32, #tpu.memory_space<vmem>>, %arg9: memref<2x512xf32, #tpu.memory_space<vmem>>, %arg10: memref<1x2x1xf32, #tpu.memory_space<vmem>>) attributes {dimension_semantics = [#tpu.dimension_semantics<parallel>, #tpu.dimension_semantics<arbitrary>], iteration_bounds = array<i64: 2, 2>, scalar_prefetch = 0 : i64, scratch_operands = 0 : i64, tpu.core_type = #tpu.core_type<tc>, window_params = [{pipeline_mode = #tpu.pipeline_mode<synchronous>, transform_indices = @transform_0, window_bounds = array<i64: 2, 1>}, {transform_indices = @transform_1, window_bounds = array<i64: 2, 512>}, {transform_indices = @transform_2, window_bounds = array<i64: 2, 512>}, {transform_indices = @transform_3, window_bounds = array<i64: 2, 512>}, {transform_indices = @transform_4, window_bounds = array<i64: 2, 512>}, {transform_indices = @transform_5, window_bounds = array<i64: 512, 512>}, {transform_indices = @transform_6, window_bounds = array<i64: 1, 512>}, {transform_indices = @transform_7, window_bounds = array<i64: 2, 512>}, {transform_indices = @transform_8, window_bounds = array<i64: 1, 2, 1>}]} {
    %c0_i32 = arith.constant 0 : i32
    %0 = arith.cmpi eq, %arg1, %c0_i32 : i32
    %1 = arith.extui %0 : i1 to i32
    %c0_i32_0 = arith.constant 0 : i32
    %2 = arith.cmpi ne, %1, %c0_i32_0 : i32
    scf.if %2 {
      %cst_15 = arith.constant 0.000000e+00 : f32
      %24 = vector.broadcast %cst_15 : f32 to vector<2x512xf32>
      %c0_16 = arith.constant 0 : index
      %c0_17 = arith.constant 0 : index
      %25 = vector.load %arg9[%c0_16, %c0_17] : memref<2x512xf32, #tpu.memory_space<vmem>>, vector<2x512xf32>
      tpu.vector_store %arg9[%c0_16, %c0_17], %24 {strides = array<i32>} : memref<2x512xf32, #tpu.memory_space<vmem>>, vector<2x512xf32>,
    } else {
    }
    %c0 = arith.constant 0 : index
    %c0_1 = arith.constant 0 : index
    %3 = vector.load %arg2[%c0, %c0_1] : memref<2x1xf32, #tpu.memory_space<vmem>>, vector<2x1xf32>
    %cst = arith.constant 1.000000e+00 : f32
    %4 = vector.broadcast %cst : f32 to vector<2x1xf32>
    %5 = arith.mulf %4, %3 : vector<2x1xf32>
    %cst_2 = arith.constant 1.000000e+00 : f32
    %6 = vector.broadcast %cst_2 : f32 to vector<2x1xf32>
    %7 = arith.subf %6, %5 : vector<2x1xf32>
    %c0_3 = arith.constant 0 : index
    %c0_4 = arith.constant 0 : index
    %8 = vector.load %arg3[%c0_3, %c0_4] : memref<2x512xf32, #tpu.memory_space<vmem>>, vector<2x512xf32>
    %9 = vector.broadcast %7 : vector<2x1xf32> to vector<2x512xf32>
    %10 = arith.mulf %9, %8 : vector<2x512xf32>
    %c0_5 = arith.constant 0 : index
    %c0_6 = arith.constant 0 : index
    %11 = vector.load %arg4[%c0_5, %c0_6] : memref<2x512xf32, #tpu.memory_space<vmem>>, vector<2x512xf32>
    %12 = vector.broadcast %3 : vector<2x1xf32> to vector<2x512xf32>
    %13 = arith.mulf %12, %11 : vector<2x512xf32>
    %14 = arith.addf %10, %13 : vector<2x512xf32>
    %c0_7 = arith.constant 0 : index
    %c0_8 = arith.constant 0 : index
    %15 = vector.load %arg9[%c0_7, %c0_8] : memref<2x512xf32, #tpu.memory_space<vmem>>, vector<2x512xf32>
    %16 = arith.truncf %14 : vector<2x512xf32> to vector<2x512xbf16>
    %c0_9 = arith.constant 0 : index
    %c0_10 = arith.constant 0 : index
    %17 = vector.load %arg7[%c0_9, %c0_10] : memref<512x512xbf16, #tpu.memory_space<vmem>>, vector<512x512xbf16>
    %cst_11 = arith.constant dense<0.000000e+00> : vector<2x512xf32>
    %18 = tpu.matmul %16, %17, %cst_11 {dimension_numbers = #tpu.dot_dimension_numbers<[1], [0], [0], [1], [0, 0, 1, 1], [], []>} : vector<2x512xbf16>, vector<512x512xbf16>, vector<2x512xf32> -> vector<2x512xf32>
    %19 = arith.addf %15, %18 : vector<2x512xf32>
    %c0_12 = arith.constant 0 : index
    %c0_13 = arith.constant 0 : index
    %20 = vector.load %arg9[%c0_12, %c0_13] : memref<2x512xf32, #tpu.memory_space<vmem>>, vector<2x512xf32>
    tpu.vector_store %arg9[%c0_12, %c0_13], %19 {strides = array<i32>} : memref<2x512xf32, #tpu.memory_space<vmem>>, vector<2x512xf32>,
    %c1_i32 = arith.constant 1 : i32
    %21 = arith.cmpi eq, %arg1, %c1_i32 : i32
    %22 = arith.extui %21 : i1 to i32
    %c0_i32_14 = arith.constant 0 : i32
    %23 = arith.cmpi ne, %22, %c0_i32_14 : i32
    scf.if %23 {
      %c0_15 = arith.constant 0 : index
      %c0_16 = arith.constant 0 : index
      %24 = vector.load %arg9[%c0_15, %c0_16] : memref<2x512xf32, #tpu.memory_space<vmem>>, vector<2x512xf32>
      %c0_17 = arith.constant 0 : index
      %c0_18 = arith.constant 0 : index
      %25 = vector.load %arg8[%c0_17, %c0_18] : memref<1x512xf32, #tpu.memory_space<vmem>>, vector<1x512xf32>
      %26 = vector.broadcast %3 : vector<2x1xf32> to vector<2x512xf32>
      %27 = vector.broadcast %25 : vector<1x512xf32> to vector<2x512xf32>
      %28 = arith.mulf %26, %27 : vector<2x512xf32>
      %29 = arith.addf %24, %28 : vector<2x512xf32>
      %c0_19 = arith.constant 0 : index
      %c0_20 = arith.constant 0 : index
      %30 = vector.load %arg9[%c0_19, %c0_20] : memref<2x512xf32, #tpu.memory_space<vmem>>, vector<2x512xf32>
      tpu.vector_store %arg9[%c0_19, %c0_20], %29 {strides = array<i32>} : memref<2x512xf32, #tpu.memory_space<vmem>>, vector<2x512xf32>,
      %c0_21 = arith.constant 0 : index
      %c0_22 = arith.constant 0 : index
      %31 = vector.load %arg6[%c0_21, %c0_22] : memref<2x512xf32, #tpu.memory_space<vmem>>, vector<2x512xf32>
      %c0_23 = arith.constant 0 : index
      %c0_24 = arith.constant 0 : index
      %32 = vector.load %arg5[%c0_23, %c0_24] : memref<2x512xf32, #tpu.memory_space<vmem>>, vector<2x512xf32>
      %cst_25 = arith.constant 1.000000e+00 : f32
      %33 = vector.broadcast %cst_25 : f32 to vector<2x512xf32>
      %34 = arith.mulf %33, %32 : vector<2x512xf32>
      %35 = arith.subf %31, %34 : vector<2x512xf32>
      %36 = arith.subf %29, %35 : vector<2x512xf32>
      %37 = arith.mulf %36, %36 : vector<2x512xf32>
      %cst_26 = arith.constant dense<0.000000e+00> : vector<2xf32>
      %38 = vector.multi_reduction <add>, %37, %cst_26 [1] : vector<2x512xf32> to vector<2xf32>
      %39 = vector.shape_cast %38 : vector<2xf32> to vector<2x1xf32>
      %40 = vector.shape_cast %39 : vector<2x1xf32> to vector<1x2x1xf32>
      %c0_27 = arith.constant 0 : index
      %c0_28 = arith.constant 0 : index
      %c0_29 = arith.constant 0 : index
      %41 = vector.load %arg10[%c0_27, %c0_28, %c0_29] : memref<1x2x1xf32, #tpu.memory_space<vmem>>, vector<1x2x1xf32>
      tpu.vector_store %arg10[%c0_27, %c0_28, %c0_29], %40 {strides = array<i32>} : memref<1x2x1xf32, #tpu.memory_space<vmem>>, vector<1x2x1xf32>,
    } else {
    }
    return
  }
  func.func @transform_0(%arg0: i32, %arg1: i32) -> (i32, i32) {
    %c0_i32 = arith.constant 0 : i32
    %c0_i32_0 = arith.constant 0 : i32
    %c0_i32_1 = arith.constant 0 : i32
    return %c0_i32, %c0_i32_0 : i32, i32
  }
  func.func @transform_1(%arg0: i32, %arg1: i32) -> (i32, i32) {
    %c0_i32 = arith.constant 0 : i32
    %c0_i32_0 = arith.constant 0 : i32
    return %c0_i32, %arg1 : i32, i32
  }
  func.func @transform_2(%arg0: i32, %arg1: i32) -> (i32, i32) {
    %c0_i32 = arith.constant 0 : i32
    %c0_i32_0 = arith.constant 0 : i32
    return %c0_i32, %arg1 : i32, i32
  }
  func.func @transform_3(%arg0: i32, %arg1: i32) -> (i32, i32) {
    %c0_i32 = arith.constant 0 : i32
    %c0_i32_0 = arith.constant 0 : i32
    return %c0_i32, %arg0 : i32, i32
  }
  func.func @transform_4(%arg0: i32, %arg1: i32) -> (i32, i32) {
    %c0_i32 = arith.constant 0 : i32
    %c0_i32_0 = arith.constant 0 : i32
    return %c0_i32, %arg0 : i32, i32
  }
  func.func @transform_5(%arg0: i32, %arg1: i32) -> (i32, i32) {
    %c0_i32 = arith.constant 0 : i32
    return %arg1, %arg0 : i32, i32
  }
  func.func @transform_6(%arg0: i32, %arg1: i32) -> (i32, i32) {
    %c0_i32 = arith.constant 0 : i32
    %c0_i32_0 = arith.constant 0 : i32
    return %c0_i32, %arg0 : i32, i32
  }
  func.func @transform_7(%arg0: i32, %arg1: i32) -> (i32, i32) {
    %c0_i32 = arith.constant 0 : i32
    %c0_i32_0 = arith.constant 0 : i32
    return %c0_i32, %arg0 : i32, i32
  }
  func.func @transform_8(%arg0: i32, %arg1: i32) -> (i32, i32, i32) {
    %c0_i32 = arith.constant 0 : i32
    %c0_i32_0 = arith.constant 0 : i32
    %c0_i32_1 = arith.constant 0 : i32
    return %arg0, %c0_i32, %c0_i32_0 : i32, i32, i32
  }
}

</mosaic_0001>

<bundles_post_ra>
// kernel: tpu_custom_call.1
= control target key start
LH: loop header
LB: loop body
LE: loop exit
PB: predicated region body
PF: predicated region fallthrough
CT: control target
= control target key end

     0   :  { %s3423_s0 = inlined_call_operand.vmem [shape: f32[2,1], index: 0, kind: input, shape index: {}]   ;;  %s3424_s1 = inlined_call_operand.hbm [shape: f32[2,1024], index: 1, kind: input, shape index: {}]   ;;  %s3425_s2 = inlined_call_operand.hbm [shape: f32[2,1024], index: 2, kind: input, shape index: {}]   ;;  %s3426_s3 = inlined_call_operand.hbm [shape: f32[2,1024], index: 3, kind: input, shape index: {}]   ;;  %s3427_s4 = inlined_call_operand.hbm [shape: f32[2,1024], index: 4, kind: input, shape index: {}]   ;;  %s3428_s5 = inlined_call_operand.hbm [shape: bf16[1024,1024], index: 5, kind: input, shape index: {}]   ;;  %s3429_s6 = inlined_call_operand.hbm [shape: f32[1,1024], index: 6, kind: input, shape index: {}]   ;;  %s3430_s7 = inlined_call_operand.hbm [shape: f32[2,1024], index: 7, kind: output, shape index: {0}]   ;;  %s3431_s8 = inlined_call_operand.vmem [shape: f32[2,2,1], index: 8, kind: output, shape index: {1}]  }
   0x1   :  { %3463 = sst [smem:[#allocation39_spill]] %s3423_s0 }
   0x2   :  { %3464 = sst [smem:[#allocation40_spill]] %s3425_s2 }
   0x3   :  { %3465 = sst [smem:[#allocation41_spill]] %s3426_s3 }
   0x4   :  { %3466 = sst [smem:[#allocation42_spill]] %s3427_s4 }
   0x5   :  { %3467 = sst [smem:[#allocation43_spill]] %s3428_s5 }
   0x6   :  { %3468 = sst [smem:[#allocation44_spill]] %s3429_s6 }
   0x7   :  { %3469 = sst [smem:[#allocation45_spill]] %s3430_s7 }
   0x8   :  { %3470 = sst [smem:[#allocation46_spill]] %s3431_s8 }
   0x9   :  { %14 = vsyncpa [#allocation3], 0 }
   0xa   :  { %16 = vsyncpa [#allocation3 + $0x1], 0 }
   0xb   :  { %17 = vsyncpa [#allocation6], 0 }
   0xc   :  { %19 = vsyncpa [#allocation6 + $0x1], 0 }
   0xd   :  { %20 = vsyncpa [#allocation9], 0 }
   0xe   :  { %22 = vsyncpa [#allocation9 + $0x1], 0 }
   0xf   :  { %23 = vsyncpa [#allocation12], 0 }
  0x10   :  { %25 = vsyncpa [#allocation12 + $0x1], 0 }
  0x11   :  { %26 = vsyncpa [#allocation4], 0 }
  0x12   :  { %28 = vsyncpa [#allocation4 + $0x1], 0  ;;  %s2832_s27 = smov 0   ;;  %s2834_s28 = smov 0  }
  0x13   :  { %s2836_s29 = smov 0   ;;  %s2838_s30 = smov 0  }
  0x14   :  { %s2840_s9 = smov 0   ;;  %s2842_s10 = smov 0  }
  0x15   :  { %s2844_s11 = smov 0   ;;  %s2846_s12 = smov 0  }
  0x16   :  { %s2848_s13 = smov 0   ;;  %s2850_s14 = smov 0  }
  0x17   :  { %s2852_s15 = smov 0   ;;  %s2854_s16 = smov 0  }
  0x18   :  { %s2856_s17 = smov 0   ;;  %s2858_s18 = smov 0  }
  0x19 LB: > { %3471 = sst [smem:[#allocation21_spill]] %s2724_s28  ;;  %s2901_s19 = sadd.s32 4294967295, %s2772_s18   ;;  %s2772_s18 = sphi %s2858_s18, %s34_s18   ;;  %s2768_s17 = sphi %s2856_s17, %s3552_s17   ;;  %s2764_s16 = sphi %s2854_s16, %s3551_s16   ;;  %s2760_s15 = sphi %s2852_s15, %s3550_s15   ;;  %s2756_s14 = sphi %s2850_s14, %s3549_s14   ;;  %s2752_s13 = sphi %s2848_s13, %s3548_s13   ;;  %s2748_s12 = sphi %s2846_s12, %s3547_s12   ;;  %s2744_s11 = sphi %s2844_s11, %s3541_s11   ;;  %s2740_s10 = sphi %s2842_s10, %s3540_s10   ;;  %s2736_s9 = sphi %s2840_s9, %s3539_s9   ;;  %s2732_s30 = sphi %s2838_s30, %s3538_s30   ;;  %s2728_s29 = sphi %s2836_s29, %s3546_s29   ;;  %s2724_s28 = sphi %s2834_s28, %s3545_s28   ;;  %s2720_s27 = sphi %s2832_s27, %s3536_s27  }
  0x1a   : > { %3472 = sst [smem:[#allocation22_spill]] %s2732_s30  ;;  %s43_s20 = sadd.s32 1, %s2764_s16 }
  0x1b   : > { %3473 = sst [smem:[#allocation23_spill]] %s2736_s9  ;;  %p44_p0 = scmp.ge.s32.totalorder %s43_s20, 2 }
  0x1c   : > { %3474 = sst [smem:[#allocation24_spill]] %s2740_s10  ;;  %s46_s21 = sadd.s32 1, %s2768_s17 }
  0x1d   : > { %3475 = sst [smem:[#allocation25_spill]] %s2748_s12  ;;  %s74_s22 = sadd.s32 1, %s2752_s13 }
  0x1e   : > { %3476 = sst [smem:[#allocation26_spill]] %s2756_s14  ;;  %p81_p1 = scmp.ne.s32.totalorder %s2752_s13, %s2748_s12 }
  0x1f   : > { %3477 = sst [smem:[#allocation27_spill]] %s2760_s15  ;;  %s3554_s20 = smov (%p44_p0, %s43_s20), 0 }
  0x20   : > { %3478 = sst [smem:[#allocation28_spill]] %s2772_s18  ;;  %s3556_s21 = smov (!%p44_p0, %s46_s21), %s2768_s17 }
  0x21   : > { %3479 = sst [smem:[#allocation29_spill]] %s3554_s20  ;;  %s71_s23 = ssub.s32 %s2764_s16, %s3554_s20 }
  0x22   : > { %p3444_p2 = scmp.eq.s32.totalorder %s2772_s18, 0  ;;  %p48_p3 = scmp.ge.s32.totalorder %s3556_s21, 2 }
  0x23   : > { %p72_p4 = scmp.eq.s32.totalorder %s71_s23, 0  ;;  %p87_p6 = scmp.ne.s32.totalorder %s2748_s12, %s2744_s11 }
  0x24   : > { %p2916_p5 = por %p3444_p2, %p81_p1  ;;  %s3558_s21 = smov (%p48_p3, %s3556_s21), 0 }
  0x25   : > { %3481 = sst [smem:[#allocation30_spill]] %s3558_s21  ;;  %p3443_p7 = scmp.eq.s32.totalorder %s2901_s19, 0 }
  0x26   : > { %s2924_s25 = scalar_select %p72_p4, %s2752_s13, %s74_s22  }
  0x27   : > { %s2929_s26 = ssub.s32 %s2768_s17, %s3558_s21  ;;  %p2935_p9 = por %p3443_p7, %p87_p6 }
  0x28   : > { %3482 = sst [smem:[#allocation31_spill]] %s2924_s25  ;;  %p124_p8 = scmp.eq.s32.totalorder %s2929_s26, 0 }
  0x29   : > { %s177_s20 = sor.u32 %s2929_s26, %s71_s23  ;;  %s180_s22 = sadd.s32 1, %s2728_s29 }
  0x2a   : > { %s3483_s11 = scalar_select %p2935_p9, 1, 0 }
  0x2b   : > { %p178_p10 = scmp.eq.s32.totalorder %s177_s20, 0  ;;  %p187_p11 = scmp.ne.s32.totalorder %s2728_s29, %s2724_s28 }
  0x2c   : > { %3484 = sst [smem:[#allocation32_spill]] %s3483_s11  ;;  %p193_p13 = scmp.ne.s32.totalorder %s2724_s28, %s2720_s27 }
  0x2d   : > { %s2943_s25 = scalar_select %p178_p10, %s2728_s29, %s180_s22  }
  0x2e   : > { %p2947_p12 = por %p187_p11, %p3444_p2  ;;  %p3446_p0 = scmp.lt.s32.totalorder %s2772_s18, 4 }
  0x2f   : > { %3485 = sst [smem:[#allocation33_spill]] %s2943_s25  ;;  %p2956_p1 = por %p193_p13, %p3443_p7 }
  0x30   : > { %s3438_s20 = sand.u32 1, %s2752_s13   ;;  %s3449_s22 = sshll.u32 %s2764_s16, 7 }
  0x31   : > { %s3487_s23 = scalar_select %p2956_p1, 1, 0 }
  0x32   : > { %s2963_s7 = sshll.u32 %s3438_s20, 3  ;;  %p2970_p3 = pnand %p3446_p0, %p2916_p5 }
  0x33   : > { %3488 = sst [smem:[#allocation34_spill]] %s3487_s23  ;;  %s3450_s27 = sand.u32 1, %s2772_s18  }
  0x34   : > { %s3490_s2 = sld [smem:[#allocation40_spill]]  ;;  %s321_s15 = scalar_lea.vmem [#allocation5], %s2963_s7 }
  0x35   : > { %s329_s23 = sshll.u32 %s321_s15, 4  ;;  %s1931_s20 = sshll.u32 %s2768_s17, 2  ;;  %s330_s23 = int_to_ptr.vmem [resolvable:$true] %s329_s23 }
  0x36   : > { %s2085_s28 = sshll.u32 %s2764_s16, 9  ;;  %s2985_s24 = scalar_lea.sflag [#allocation6], %s3450_s27 }
  0x37   : > { %p3445_p4 = pneg %p2970_p3  ;;  %s2453_s11 = scalar_lea.vmem %s330_s23, 128 }
  0x38   : > { %p2454_p5 = scmp.ne.s32.totalorder %s330_s23, %s2453_s11  ;;  %s2774_s12 = smov [#allocation5]  }
  0x39   : > { %s2458_s6 = sshll.u32 %s2774_s12, 4  ;;  %s2459_s6 = int_to_ptr.vmem [resolvable:$false] %s2458_s6 }
  0x3a   : > { %s327_s8 = scalar_lea.hbm %s3490_s2, %s3449_s22  ;;  %p2456_p6 = pnand %p2454_p5, %p3445_p4 }
  0x3b   : > { %s2460_s0 = scalar_lea.vmem %s2459_s6, 256  ;;  %p2461_p11 = scmp.lt.s32.totalorder %s330_s23, %s2459_s6 }
  0x3c   : > { %p2457_p10 = pneg %p2456_p6  ;;  %p2462_p13 = scmp.lt.s32.totalorder %s2460_s0, %s2453_s11 }
  0x3e   : > { %p2463_p7 = por %p2462_p13, %p2461_p11 }
  0x40   : > { %p2464_p2 = pnand %p2463_p7, %p2457_p10 }
  0x42   : > { %2467 = shalt.err (!%p2464_p2)
}
  0x43   : > { %2108 = dma.hbm_to_vmem [thread:$0]  (!%p2970_p3), %s327_s8, 128, %s330_s23, %s2985_s24  }
  0x44   : > { %s385_s6 = sadd.s32 %s2085_s28, %s1931_s20  ;;  %p2999_p2 = pnand %p3446_p0, %p2947_p12 }
  0x45   : > { %s1933_s14 = sshll.u32 %s385_s6, 6  ;;  %p1937_p7 = scmp.ge.s32.totalorder %s2772_s18, 1 }
  0x46   : > { %s3492_s5 = sld [smem:[#allocation43_spill]]  ;;  %p415_p5 = scmp.lt.s32.totalorder %s2772_s18, 5 }
  0x47   : > { %s1914_s28 = sadd.s32 4294967294, %s2772_s18   ;;  %s126_s21 = sadd.s32 1, %s2740_s10 }
  0x48   : > { %p3010_p6 = pnand %p1937_p7, %p415_p5  ;;  %p133_p12 = scmp.ne.s32.totalorder %s2740_s10, %s2736_s9 }
  0x49   : > { %s3019_s23 = scalar_select %p124_p8, %s2740_s10, %s126_s21  }
  0x4a   : > { %p139_p10 = scmp.ne.s32.totalorder %s2736_s9, %s2732_s30  ;;  %p243_p11 = scmp.eq.s32.totalorder %s2901_s19, 3 }
  0x4b   : > { %3494 = sst [smem:[#allocation35_spill]] %s3019_s23  ;;  %p249_p13 = scmp.eq.s32.totalorder %s1914_s28, 3 }
  0x4c   : > { %s3007_s0 = scalar_lea.hbm %s3492_s5, %s1933_s14  ;;  %p3495_p4 = scmp.eq.s32.totalorder %s2772_s18, 0 }
  0x4d   : > { %p3496_p1 = scmp.eq.s32.totalorder %s2901_s19, 0  ;;  %p3034_p7 = por %p243_p11, %p133_p12 }
  0x4e   : > { %p135_p0 = por %p133_p12, %p3495_p4  ;;  %p3038_p5 = por %p249_p13, %p139_p10 }
  0x4f   : > { %p3030_p9 = por %p139_p10, %p3496_p1  ;;  %s3043_s14 = sand.u32 1, %s2740_s10  }
  0x50   : > { %s3499_s6 = scalar_select %p3034_p7, 1, 0 }
  0x51   : > { %s3497_s20 = scalar_select %p3030_p9, 1, 0 }
  0x52   : > { %3500 = sst [smem:[#allocation37_spill]] %s3499_s6  ;;  %s2083_s15 = sshll.u32 %s2768_s17, 7 }
  0x53   : > { %3498 = sst [smem:[#allocation36_spill]] %s3497_s20  ;;  %s1923_s11 = sshll.u32 %s3043_s14, 3 }
  0x54   : > { %s3501_s26 = scalar_select %p3038_p5, 1, 0 }
  0x55   : > { %s3503_s3 = sld [smem:[#allocation41_spill]]  ;;  %p3504_p8 = scmp.lt.s32.totalorder %s2772_s18, 4 }
  0x56   : > { %3502 = sst [smem:[#allocation38_spill]] %s3501_s26  ;;  %s359_s10 = scalar_lea.vmem [#allocation8], %s1923_s11 }
  0x57   : > { %p3054_p1 = pnand %p3504_p8, %p135_p0  ;;  %s3506_s4 = sld [smem:[#allocation42_spill]] }
  0x58   : > { %s367_s26 = sshll.u32 %s359_s10, 4  ;;  %s3507_s30 = sand.u32 1, %s2772_s18   ;;  %s368_s26 = int_to_ptr.vmem [resolvable:$true] %s367_s26 }
  0x59   : > { %s3063_s6 = scalar_lea.sflag [#allocation9], %s3507_s30  ;;  %p3461_p4 = pneg %p3054_p1 }
  0x5a   : > { %s2481_s28 = scalar_lea.vmem %s368_s26, 128  ;;  %s2775_s21 = smov [#allocation8]  }
  0x5b   : > { %s3050_s22 = scalar_lea.hbm %s3503_s3, %s2083_s15  ;;  %p2482_p12 = scmp.ne.s32.totalorder %s368_s26, %s2481_s28 }
  0x5c   : > { %s2486_s3 = sshll.u32 %s2775_s21, 4  ;;  %s2487_s3 = int_to_ptr.vmem [resolvable:$false] %s2486_s3 }
  0x5d   : > { %s365_s23 = scalar_lea.hbm %s3506_s4, %s2083_s15  ;;  %p2484_p0 = pnand %p2482_p12, %p3461_p4 }
  0x5e   : > { %s2488_s2 = scalar_lea.vmem %s2487_s3, 256  ;;  %p2489_p11 = scmp.lt.s32.totalorder %s368_s26, %s2487_s3 }
  0x5f   : > { %p2485_p10 = pneg %p2484_p0  ;;  %p2490_p13 = scmp.lt.s32.totalorder %s2488_s2, %s2481_s28 }
  0x61   : > { %p2491_p8 = por %p2490_p13, %p2489_p11 }
  0x63   : > { %p2492_p5 = pnand %p2491_p8, %p2485_p10 }
  0x65   : > { %2495 = shalt.err (!%p2492_p5)
}
  0x66   : > { %2114 = dma.hbm_to_vmem [thread:$0]  (!%p3054_p1), %s365_s23, 128, %s368_s26, %s3063_s6  }
  0x67   : > { %s3508_s5 = sshll.u32 %s2764_s16, 7  ;;  %s302_s21 = scalar_lea.vmem [#allocation2], %s2963_s7 }
  0x68   : > { %s308_s15 = scalar_lea.hbm %s3424_s1, %s3508_s5  ;;  %s310_s4 = sshll.u32 %s302_s21, 4  ;;  %s311_s4 = int_to_ptr.vmem [resolvable:$true] %s310_s4 }
  0x69   : > { %s340_s3 = scalar_lea.vmem [#allocation7], %s1923_s11  ;;  %s3509_s2 = sand.u32 1, %s2752_s13  }
  0x6a   : > { %s348_s28 = sshll.u32 %s340_s3, 4  ;;  %s299_s18 = scalar_lea.sflag [#allocation3], %s3509_s2  ;;  %s349_s28 = int_to_ptr.vmem [resolvable:$true] %s348_s28 }
  0x6b   : > { %s2509_s20 = scalar_lea.vmem %s311_s4, 128  ;;  %p3510_p12 = pneg %p2970_p3 }
  0x6c   : > { %p2510_p5 = scmp.ne.s32.totalorder %s311_s4, %s2509_s20  ;;  %s2776_s9 = smov [#allocation2]  }
  0x6d   : > { %s2514_s23 = sshll.u32 %s2776_s9, 4  ;;  %s2515_s23 = int_to_ptr.vmem [resolvable:$false] %s2514_s23 }
  0x6e   : > { %p2512_p0 = pnand %p2510_p5, %p3510_p12  ;;  %s2516_s26 = scalar_lea.vmem %s2515_s23, 256 }
  0x6f   : > { %p2517_p11 = scmp.lt.s32.totalorder %s311_s4, %s2515_s23  ;;  %p2518_p13 = scmp.lt.s32.totalorder %s2516_s26, %s2509_s20 }
  0x70   : > { %p2513_p10 = pneg %p2512_p0 }
  0x71   : > { %p2519_p8 = por %p2518_p13, %p2517_p11 }
  0x73   : > { %p2520_p4 = pnand %p2519_p8, %p2513_p10 }
  0x75   : > { %2523 = shalt.err (!%p2520_p4)
}
  0x76   : > { %2105 = dma.hbm_to_vmem [thread:$0]  (!%p2970_p3), %s308_s15, 128, %s311_s4, %s299_s18  }
  0x77   : > { %s376_s7 = sand.u32 1, %s2728_s29   ;;  %s2537_s11 = scalar_lea.vmem %s349_s28, 128 }
  0x78   : > { %p2538_p7 = scmp.ne.s32.totalorder %s349_s28, %s2537_s11  ;;  %p3511_p5 = pneg %p3054_p1 }
  0x79   : > { %s2777_s9 = smov [#allocation7]  }
  0x7a   : > { %p2540_p12 = pnand %p2538_p7, %p3511_p5  ;;  %s2542_s5 = sshll.u32 %s2777_s9, 4  ;;  %s2543_s5 = int_to_ptr.vmem [resolvable:$false] %s2542_s5 }
  0x7b   : > { %s2544_s20 = scalar_lea.vmem %s2543_s5, 256  ;;  %p2545_p11 = scmp.lt.s32.totalorder %s349_s28, %s2543_s5 }
  0x7c   : > { %p2541_p0 = pneg %p2540_p12  ;;  %p2546_p10 = scmp.lt.s32.totalorder %s2544_s20, %s2537_s11 }
  0x7e   : > { %p2547_p4 = por %p2546_p10, %p2545_p11 }
  0x80   : > { %p2548_p13 = pnand %p2547_p4, %p2541_p0 }
  0x82   : > { %2551 = shalt.err (!%p2548_p13)
}
  0x83   : > { %2111 = dma.hbm_to_vmem [thread:$0]  (!%p3054_p1), %s3050_s22, 128, %s349_s28, %s2985_s24  }
  0x84   : > { %s1929_s4 = sshll.u32 %s376_s7, 10  ;;  %p2554_p3 = pneg %p2999_p2 }
  0x85   : > { %s378_s18 = scalar_lea.vmem [#allocation10], %s1929_s4  ;;  %s2778_s10 = smov [#allocation10]  }
  0x86   : > { %s388_s25 = sshll.u32 %s378_s18, 4  ;;  %s2570_s15 = sshll.u32 %s2778_s10, 4  ;;  %s389_s25 = int_to_ptr.vmem [resolvable:$true] %s388_s25  ;;  %s2571_s15 = int_to_ptr.vmem [resolvable:$false] %s2570_s15 }
  0x87   : > { %s2565_s30 = scalar_lea.vmem %s389_s25, 16384  ;;  %s2572_s21 = scalar_lea.vmem %s2571_s15, 32768 }
  0x88   : > { %p2566_p7 = scmp.ne.s32.totalorder %s389_s25, %s2565_s30  ;;  %p2573_p12 = scmp.lt.s32.totalorder %s389_s25, %s2571_s15 }
  0x89   : > { %p2574_p0 = scmp.lt.s32.totalorder %s2572_s21, %s2565_s30 }
  0x8a   : > { %p2568_p8 = pnand %p2566_p7, %p2554_p3 }
  0x8b   : > { %p2575_p11 = por %p2574_p0, %p2573_p12 }
  0x8c   : > { %p2569_p5 = pneg %p2568_p8 }
  0x8e   : > { %p2576_p10 = pnand %p2575_p11, %p2569_p5 }
  0x90   : > { %2579 = shalt.err (!%p2576_p10)
}
  0x91   : > { %s2779_s22 = smov 512   ;;  %s2780_s24 = smov 256  }
  0x92   : > { %s2781_s3 = smov 16   ;;  %s1934_s28 = sshll.u32 %s3043_s14, 2 }
  0x93   : > { %2117 = dma.hbm_to_vmem [thread:$0]  (!%p2999_p2), %s3007_s0, 16384, %s389_s25, %s3063_s6, %s2779_s22, %s2780_s24, %s2781_s3  }
  0x94   : > { %s2086_s2 = sshll.u32 %s2768_s17, 6  ;;  %s3512_s7 = sld [smem:[#allocation44_spill]] }
  0x95   : > { %s402_s9 = scalar_lea.vmem [#allocation11], %s1934_s28  ;;  %s399_s20 = scalar_lea.sflag [#allocation12], %s3043_s14 }
  0x96   : > { %s410_s5 = sshll.u32 %s402_s9, 4  ;;  %p3513_p13 = pneg %p3054_p1  ;;  %s411_s5 = int_to_ptr.vmem [resolvable:$true] %s410_s5 }
  0x97   : > { %s2593_s4 = scalar_lea.vmem %s411_s5, 64  ;;  %s2782_s18 = smov [#allocation11]  }
  0x98   : > { %p2594_p4 = scmp.ne.s32.totalorder %s411_s5, %s2593_s4  ;;  %s2598_s30 = sshll.u32 %s2782_s18, 4  ;;  %s2599_s30 = int_to_ptr.vmem [resolvable:$false] %s2598_s30 }
  0x99   : > { %s2600_s12 = scalar_lea.vmem %s2599_s30, 128  ;;  %p2601_p2 = scmp.lt.s32.totalorder %s411_s5, %s2599_s30 }
  0x9a   : > { %s408_s11 = scalar_lea.hbm %s3512_s7, %s2086_s2  ;;  %p2596_p3 = pnand %p2594_p4, %p3513_p13 }
  0x9b   : > { %p2602_p8 = scmp.lt.s32.totalorder %s2600_s12, %s2593_s4 }
  0x9c   : > { %p2597_p7 = pneg %p2596_p3 }
  0x9d   : > { %p2603_p5 = por %p2602_p8, %p2601_p2 }
  0x9f   : > { %p2604_p12 = pnand %p2603_p5, %p2597_p7 }
  0xa1   : > { %2607 = shalt.err (!%p2604_p12)
}
  0xa2   : > { %2120 = dma.hbm_to_vmem [thread:$0]  (!%p3054_p1), %s408_s11, 64, %s411_s5, %s399_s20  }
  0xa3   : > { %419 = sbr.rel (%p3010_p6) target bundleno = 828 (0x33c), region = 48  ;;  %s3514_s0 = sld [smem:[#allocation25_spill]] (!%p3010_p6) }
  0xa4   : > { %s3515_s6 = sld [smem:[#allocation32_spill]] (!%p3010_p6) }
  0xa9   : > { %s421_s14 = sand.u32 1, %s3514_s0  }
  0xaa   : > { %s3114_s25 = sshll.u32 %s421_s14, 3  ;;  %s422_s10 = scalar_lea.sflag [#allocation3], %s421_s14 }
  0xab   : > { %s425_s15 = scalar_lea.vmem [#allocation2], %s3114_s25  ;;  %p3516_p0 = scmp.ne.s32.totalorder %s3515_s6, 0 }
  0xad   : > { %2691 = dma.done.wait (%p3516_p0), %s422_s10, 128  }
  0xae   : > { %2693 = vsyncadd (%p3516_p0), %s422_s10, 4294967168  ;;  %s430_s27 = sand.u32 1, %s2901_s19   ;;  %s434_s8 = scalar_lea.vmem [#allocation5], %s3114_s25 }
  0xaf   : > { %s431_s21 = scalar_lea.sflag [#allocation6], %s430_s27 }
  0xb0   : > { %2695 = dma.done.wait (%p3516_p0), %s431_s21, 128  }
  0xb1   : > { %2697 = vsyncadd (%p3516_p0), %s431_s21, 4294967168  ;;  %s3517_s22 = sld [smem:[#allocation23_spill]] }
  0xb7   : > { %s3128_s3 = sand.u32 1, %s3517_s22  }
  0xb8   : > { %s3131_s28 = sshll.u32 %s3128_s3, 3 }
  0xb9   : > { %s443_s2 = scalar_lea.vmem [#allocation7], %s3131_s28 }
  0xba   : > { %2699 = dma.done.wait (%p3030_p9), %s431_s21, 128  }
  0xbb   : > { %2701 = vsyncadd (%p3030_p9), %s431_s21, 4294967168  ;;  %s449_s19 = scalar_lea.sflag [#allocation9], %s430_s27  ;;  %s452_s23 = scalar_lea.vmem [#allocation8], %s3131_s28 }
  0xbc   : > { %2703 = dma.done.wait (%p3030_p9), %s449_s19, 128  }
  0xbd   : > { %2705 = vsyncadd (%p3030_p9), %s449_s19, 4294967168  ;;  %s3519_s26 = sld [smem:[#allocation21_spill]] }
  0xbe   : > { %s3520_s7 = sld [smem:[#allocation34_spill]] }
  0xc3   : > { %s459_s11 = sand.u32 1, %s3519_s26  }
  0xc4   : > { %s1942_s9 = sshll.u32 %s459_s11, 10  ;;  %p3521_p6 = scmp.ne.s32.totalorder %s3520_s7, 0 }
  0xc5   : > { %s3144_s5 = scalar_lea.vmem [#allocation10], %s1942_s9 }
  0xc6   : > { %2707 = dma.done.wait (%p3521_p6), %s449_s19, 16384  }
  0xc7   : > { %2709 = vsyncadd (%p3521_p6), %s449_s19, 4294950912  ;;  %s1943_s20 = sshll.u32 %s3128_s3, 2  ;;  %s467_s4 = scalar_lea.sflag [#allocation12], %s3128_s3 }
  0xc8   : > { %s3152_s18 = scalar_lea.vmem [#allocation11], %s1943_s20 }
  0xc9   : > { %2711 = dma.done.wait (%p3030_p9), %s467_s4, 64  }
  0xca   : > { %2713 = vsyncadd (%p3030_p9), %s467_s4, 4294967232  ;;  %s3522_s30 = sld [smem:[#allocation27_spill]]  ;;  %s3166_s27 = scalar_lea.vmem [#allocation13], %s3131_s28 }
  0xcb   : > { %s3523_s14 = sld [smem:[#allocation46_spill]] }
  0xcc   : > { %s3524_s21 = sld [smem:[#allocation26_spill]] }
  0xd0   : > { %p540_p1 = scmp.lt.s32.totalorder %s3522_s30, 1 }
  0xd2   : > { %s3560_s30 = smov (!%p540_p1, %s3522_s30), 1  ;;  %p1946_p11 = scmp.ne.s32.totalorder %s3524_s21, 0 }
  0xd3   : > { %s1945_s12 = sshll.u32 %s3560_s30, 1 }
  0xd4   : > { %s3163_s10 = scalar_lea.vmem %s3523_s14, %s1945_s12  ;;  %547 = sbr.rel (%p1946_p11) target bundleno = 219 (0xdb), region = 76 }
  0xd9   : > { %v2783_v0 = vmov 0.0  }
  0xda   : > { %548 = vst [vmem:[%s3166_s27] sm:$0xff] %v2783_v0 }
  0xdb PF: > { %s3525_s19 = sld [smem:[#allocation39_spill]]  ;;  %v2784_v2 = vmov 0   ;;  %v2246_v4 = vld [vmem:[%s3144_s5 + $0xe4] ss:$16 sps:$4 sm:$0xff]   ;;  %v2250_v6 = vld [vmem:[%s3144_s5 + $0xe0] ss:$16 sps:$4 sm:$0xff]  }
  0xdc   : > { %2245 = vset.pattern.permute.xlu0 %v2784_v2  ;;  %v2248_v5 = vld [vmem:[%s3144_s5 + $0x2e4] ss:$16 sps:$4 sm:$0xff]   ;;  %v2251_v7 = vld [vmem:[%s3144_s5 + $0x2e0] ss:$16 sps:$4 sm:$0xff]   ;;  %1392 = vmatprep.subr.bf16.mxu0 %v2246_v4  ;;  %v2346_v4 = vld [vmem:[%s3144_s5 + $0xec] ss:$16 sps:$4 sm:$0xff]  }
  0xdd   : > { %v2252_v8 = vld [vmem:[%s3144_s5 + $0xc4] ss:$16 sps:$4 sm:$0xff]   ;;  %1433 = vmatprep.subr.bf16.mxu1 %v2248_v5  ;;  %1393 = vmatpush1.bf16.msra.mxu0 %v2250_v6  ;;  %v2256_v10 = vld [vmem:[%s3144_s5 + $0xc0] ss:$16 sps:$4 sm:$0xff]   ;;  %v2349_v5 = vld [vmem:[%s3144_s5 + $0x2ec] ss:$16 sps:$4 sm:$0xff]  }
  0xde   : > { %v2254_v9 = vld [vmem:[%s3144_s5 + $0x2c4] ss:$16 sps:$4 sm:$0xff]   ;;  %1434 = vmatpush1.bf16.msra.mxu1 %v2251_v7  ;;  %1394 = vmatprep.subr.bf16.mxu0 %v2252_v8  ;;  %v2257_v11 = vld [vmem:[%s3144_s5 + $0x2c0] ss:$16 sps:$4 sm:$0xff]   ;;  %v2785_v6 = vmov 1983009808   ;;  %v562_v8 = vlaneseq }
  0xdf   : > { %1435 = vmatprep.subr.bf16.mxu1 %v2254_v9  ;;  %v2258_v12 = vld [vmem:[%s3144_s5 + $0xa4] ss:$16 sps:$4 sm:$0xff]   ;;  %v2262_v14 = vld [vmem:[%s3144_s5 + $0xa0] ss:$16 sps:$4 sm:$0xff]   ;;  %v560_v7 = vunpack.c.l.s4 %v2785_v6  ;;  %v2386_v6 = vld [vmem:[%s3144_s5 + $0x8] ss:$16 sps:$4 sm:$0xff]  }
  0xe0   : > { %v2260_v13 = vld [vmem:[%s3144_s5 + $0x2a4] ss:$16 sps:$4 sm:$0xff]   ;;  %v2263_v15 = vld [vmem:[%s3144_s5 + $0x2a0] ss:$16 sps:$4 sm:$0xff]   ;;  %s3526_s25 = sld [smem:[#allocation26_spill]] }
  0xe1   : > { %v549_v1 = vld [vmem:[%s3525_s19] sm:$0x3]  ;;  %1395 = vmatpush1.bf16.msra.mxu0 %v2256_v10  ;;  %v2264_v16 = vld [vmem:[%s3144_s5 + $0x84] ss:$16 sps:$4 sm:$0xff]   ;;  %v561_v9 = vunpack.c.0.s8 %v560_v7  ;;  %v3239_v10 = vshrl.u32 %v562_v8, 7 }
  0xe2   : > { %v550_v3 = vsub.f32 1.0, %v549_v1  ;;  %1436 = vmatpush1.bf16.msra.mxu1 %v2257_v11  ;;  %1396 = vmatprep.subr.bf16.mxu0 %v2258_v12  ;;  %v2266_v17 = vld [vmem:[%s3144_s5 + $0x284] ss:$16 sps:$4 sm:$0xff]   ;;  %v2268_v18 = vld [vmem:[%s3144_s5 + $0x80] ss:$16 sps:$4 sm:$0xff]  }
  0xe3   : > { %1437 = vmatprep.subr.bf16.mxu1 %v2260_v13  ;;  %v2269_v19 = vld [vmem:[%s3144_s5 + $0x280] ss:$16 sps:$4 sm:$0xff]   ;;  %v2270_v20 = vld [vmem:[%s3144_s5 + $0x64] ss:$16 sps:$4 sm:$0xff]   ;;  %v2389_v7 = vld [vmem:[%s3144_s5 + $0x208] ss:$16 sps:$4 sm:$0xff]  }
  0xe4   : > { %554 = vperm.xlu0 %2245, %v550_v3   ;;  %v2272_v21 = vld [vmem:[%s3144_s5 + $0x264] ss:$16 sps:$4 sm:$0xff]   ;;  %v2274_v22 = vld [vmem:[%s3144_s5 + $0x60] ss:$16 sps:$4 sm:$0xff]   ;;  %v2394_v8 = vld [vmem:[%s3144_s5 + $0x1ec] ss:$16 sps:$4 sm:$0xff]  }
  0xe5   : > { %1397 = vmatpush1.bf16.msra.mxu0 %v2262_v14  ;;  %v2275_v23 = vld [vmem:[%s3144_s5 + $0x260] ss:$16 sps:$4 sm:$0xff]   ;;  %v2276_v24 = vld [vmem:[%s3144_s5 + $0x44] ss:$16 sps:$4 sm:$0xff]   ;;  %v3246_v14 = vsub.s32 %v561_v9, %v3239_v10  ;;  %v2397_v9 = vld [vmem:[%s3144_s5 + $0x3ec] ss:$16 sps:$4 sm:$0xff]  }
  0xe6   : > { %1438 = vmatpush1.bf16.msra.mxu1 %v2263_v15  ;;  %1398 = vmatprep.subr.bf16.mxu0 %v2264_v16  ;;  %v2278_v25 = vld [vmem:[%s3144_s5 + $0x244] ss:$16 sps:$4 sm:$0xff]   ;;  %v2280_v26 = vld [vmem:[%s3144_s5 + $0x40] ss:$16 sps:$4 sm:$0xff]   ;;  %p2075_p9 = scmp.ne.s32.totalorder %s3526_s25, 1 }
  0xe7   : > { %1439 = vmatprep.subr.bf16.mxu1 %v2266_v17  ;;  %v2281_v27 = vld [vmem:[%s3144_s5 + $0x240] ss:$16 sps:$4 sm:$0xff]   ;;  %v2282_v28 = vld [vmem:[%s3144_s5 + $0x24] ss:$16 sps:$4 sm:$0xff]  }
  0xe8   : > { %586 = vperm.xlu0 %2245, %v549_v1   ;;  %v2284_v29 = vld [vmem:[%s3144_s5 + $0x224] ss:$16 sps:$4 sm:$0xff]   ;;  %v2286_v30 = vld [vmem:[%s3144_s5 + $0x20] ss:$16 sps:$4 sm:$0xff]  }
  0xe9   : > { %1399 = vmatpush1.bf16.msra.mxu0 %v2268_v18  ;;  %v2287_v31 = vld [vmem:[%s3144_s5 + $0x220] ss:$16 sps:$4 sm:$0xff]   ;;  %v2288_v32 = vld [vmem:[%s3144_s5 + $0x4] ss:$16 sps:$4 sm:$0xff]  }
  0xea   : > { %1440 = vmatpush1.bf16.msra.mxu1 %v2269_v19  ;;  %1400 = vmatprep.subr.bf16.mxu0 %v2270_v20  ;;  %v2290_v33 = vld [vmem:[%s3144_s5 + $0x204] ss:$16 sps:$4 sm:$0xff]   ;;  %v2292_v34 = vld [vmem:[%s3144_s5] ss:$16 sps:$4 sm:$0xff]  }
  0xeb   : > { %1441 = vmatprep.subr.bf16.mxu1 %v2272_v21  ;;  %v2293_v35 = vld [vmem:[%s3144_s5 + $0x200] ss:$16 sps:$4 sm:$0xff]   ;;  %v2294_v36 = vld [vmem:[%s3144_s5 + $0x1e4] ss:$16 sps:$4 sm:$0xff]  }
  0xec   : > { %v2296_v37 = vld [vmem:[%s3144_s5 + $0x3e4] ss:$16 sps:$4 sm:$0xff]   ;;  %v2298_v38 = vld [vmem:[%s3144_s5 + $0x1e0] ss:$16 sps:$4 sm:$0xff]  }
  0xed   : > { %1401 = vmatpush1.bf16.msra.mxu0 %v2274_v22  ;;  %v2299_v39 = vld [vmem:[%s3144_s5 + $0x3e0] ss:$16 sps:$4 sm:$0xff]   ;;  %v2300_v40 = vld [vmem:[%s3144_s5 + $0x1c4] ss:$16 sps:$4 sm:$0xff]  }
  0xee   : > { %1442 = vmatpush1.bf16.msra.mxu1 %v2275_v23  ;;  %1402 = vmatprep.subr.bf16.mxu0 %v2276_v24  ;;  %v2302_v41 = vld [vmem:[%s3144_s5 + $0x3c4] ss:$16 sps:$4 sm:$0xff]   ;;  %v2304_v42 = vld [vmem:[%s3144_s5 + $0x1c0] ss:$16 sps:$4 sm:$0xff]  }
  0xef   : > { %1443 = vmatprep.subr.bf16.mxu1 %v2278_v25  ;;  %v2305_v43 = vld [vmem:[%s3144_s5 + $0x3c0] ss:$16 sps:$4 sm:$0xff]   ;;  %v2306_v44 = vld [vmem:[%s3144_s5 + $0x1a4] ss:$16 sps:$4 sm:$0xff]  }
  0xf0   : > { %v2308_v45 = vld [vmem:[%s3144_s5 + $0x3a4] ss:$16 sps:$4 sm:$0xff]   ;;  %v2310_v46 = vld [vmem:[%s3144_s5 + $0x1a0] ss:$16 sps:$4 sm:$0xff]  }
  0xf1   : > { %1403 = vmatpush1.bf16.msra.mxu0 %v2280_v26  ;;  %v2311_v47 = vld [vmem:[%s3144_s5 + $0x3a0] ss:$16 sps:$4 sm:$0xff]   ;;  %v2312_v48 = vld [vmem:[%s3144_s5 + $0x184] ss:$16 sps:$4 sm:$0xff]  }
  0xf2   : > { %1444 = vmatpush1.bf16.msra.mxu1 %v2281_v27  ;;  %1404 = vmatprep.subr.bf16.mxu0 %v2282_v28  ;;  %v2314_v49 = vld [vmem:[%s3144_s5 + $0x384] ss:$16 sps:$4 sm:$0xff]   ;;  %v2316_v50 = vld [vmem:[%s3144_s5 + $0x180] ss:$16 sps:$4 sm:$0xff]  }
  0xf3   : > { %1445 = vmatprep.subr.bf16.mxu1 %v2284_v29  ;;  %v2317_v51 = vld [vmem:[%s3144_s5 + $0x380] ss:$16 sps:$4 sm:$0xff]   ;;  %v2318_v52 = vld [vmem:[%s3144_s5 + $0x164] ss:$16 sps:$4 sm:$0xff]  }
  0xf4   : > { %v2320_v53 = vld [vmem:[%s3144_s5 + $0x364] ss:$16 sps:$4 sm:$0xff]   ;;  %v2322_v54 = vld [vmem:[%s3144_s5 + $0x160] ss:$16 sps:$4 sm:$0xff]  }
  0xf5   : > { %1405 = vmatpush1.bf16.msra.mxu0 %v2286_v30  ;;  %v2323_v55 = vld [vmem:[%s3144_s5 + $0x360] ss:$16 sps:$4 sm:$0xff]   ;;  %v2324_v56 = vld [vmem:[%s3144_s5 + $0x144] ss:$16 sps:$4 sm:$0xff]  }
  0xf6   : > { %1446 = vmatpush1.bf16.msra.mxu1 %v2287_v31  ;;  %1406 = vmatprep.subr.bf16.mxu0 %v2288_v32  ;;  %v2326_v57 = vld [vmem:[%s3144_s5 + $0x344] ss:$16 sps:$4 sm:$0xff]   ;;  %v2328_v58 = vld [vmem:[%s3144_s5 + $0x140] ss:$16 sps:$4 sm:$0xff]  }
  0xf7   : > { %1447 = vmatprep.subr.bf16.mxu1 %v2290_v33  ;;  %v2329_v59 = vld [vmem:[%s3144_s5 + $0x340] ss:$16 sps:$4 sm:$0xff]   ;;  %v2331_v60 = vld [vmem:[%s3144_s5 + $0x124] ss:$16 sps:$4 sm:$0xff]  }
  0xf8   : > { %v2333_v61 = vld [vmem:[%s3144_s5 + $0x324] ss:$16 sps:$4 sm:$0xff]   ;;  %v2335_v62 = vld [vmem:[%s3144_s5 + $0x120] ss:$16 sps:$4 sm:$0xff]  }
  0xf9   : > { %1407 = vmatpush1.bf16.msra.mxu0 %v2292_v34  ;;  %v2336_v63 = vld [vmem:[%s3144_s5 + $0x320] ss:$16 sps:$4 sm:$0xff]   ;;  %v2338_v0 = vld [vmem:[%s3144_s5 + $0x104] ss:$16 sps:$4 sm:$0xff]  }
  0xfa   : > { %1448 = vmatpush1.bf16.msra.mxu1 %v2293_v35  ;;  %1408 = vmatprep.subr.bf16.mxu0 %v2294_v36  ;;  %v2340_v1 = vld [vmem:[%s3144_s5 + $0x304] ss:$16 sps:$4 sm:$0xff]   ;;  %v2342_v2 = vld [vmem:[%s3144_s5 + $0x100] ss:$16 sps:$4 sm:$0xff]  }
  0xfb   : > { %1449 = vmatprep.subr.bf16.mxu1 %v2296_v37  ;;  %v2343_v3 = vld [vmem:[%s3144_s5 + $0x300] ss:$16 sps:$4 sm:$0xff]  }
  0xfc   : > { %v551_v11 = vld [vmem:[%s425_s15] sm:$0xff]  ;;  %v583_v12 = vld [vmem:[%s434_s8] sm:$0xff] }
  0xfd   : > { %1409 = vmatpush2.bf16.msra.mxu0 %v2298_v38  ;;  %v558_v13 = vcombine.high %v551_v11, %v551_v11  ;;  %v590_v15 = vcombine.high %v583_v12, %v583_v12  ;;  %v565_v16 = vrot.slane %v551_v11, %v3246_v14  ;;  %v597_v18 = vrot.slane %v583_v12, %v3246_v14  ;;  %v2392_v11 = vld [vmem:[%s3144_s5 + $0x1e8] ss:$16 sps:$4 sm:$0xff]  }
  0xfe   : > { %1450 = vmatpush2.bf16.msra.mxu1 %v2299_v39  ;;  %1410 = vmatprep.subr.bf16.mxu0 %v2300_v40  ;;  %v2344_v40 = vld [vmem:[%s3144_s5 + $0xe8] ss:$16 sps:$4 sm:$0xff]  }
  0xff   : > { %1451 = vmatprep.subr.bf16.mxu1 %v2302_v41  ;;  %v572_v17 = vrot.slane %v558_v13, %v3246_v14  ;;  %v604_v19 = vrot.slane %v590_v15, %v3246_v14  ;;  %v573_v21 = vcombine.high %v565_v16, %v565_v16  ;;  %v605_v23 = vcombine.high %v597_v18, %v597_v18  ;;  %v2347_v41 = vld [vmem:[%s3144_s5 + $0x2e8] ss:$16 sps:$4 sm:$0xff]   ;;  %v2400_v13 = vld [vmem:[%s3144_s5 + $0x1cc] ss:$16 sps:$4 sm:$0xff]  }
 0x100   : > { %v2395_v12 = vld [vmem:[%s3144_s5 + $0x3e8] ss:$16 sps:$4 sm:$0xff]   ;;  %v2403_v15 = vld [vmem:[%s3144_s5 + $0x3cc] ss:$16 sps:$4 sm:$0xff]  }
 0x101   : > { %1411 = vmatpush2.bf16.msra.mxu0 %v2304_v42  ;;  %v574_v22 = vcombine.high %v572_v17, %v572_v17  ;;  %v606_v24 = vcombine.high %v604_v19, %v604_v19 }
 0x102   : > { %1452 = vmatpush2.bf16.msra.mxu1 %v2305_v43  ;;  %1412 = vmatprep.subr.bf16.mxu0 %v2306_v44  ;;  %v2352_v44 = vld [vmem:[%s3144_s5 + $0xcc] ss:$16 sps:$4 sm:$0xff]  }
 0x103   : > { %1453 = vmatprep.subr.bf16.mxu1 %v2308_v45  ;;  %v2355_v45 = vld [vmem:[%s3144_s5 + $0x2cc] ss:$16 sps:$4 sm:$0xff]  }
 0x105   : > { %1413 = vmatpush2.bf16.msra.mxu0 %v2310_v46  ;;  %v2350_v46 = vld [vmem:[%s3144_s5 + $0xc8] ss:$16 sps:$4 sm:$0xff]  }
 0x106   : > { %1454 = vmatpush2.bf16.msra.mxu1 %v2311_v47  ;;  %1414 = vmatprep.subr.bf16.mxu0 %v2312_v48  ;;  %v2353_v47 = vld [vmem:[%s3144_s5 + $0x2c8] ss:$16 sps:$4 sm:$0xff]   ;;  %v2358_v48 = vld [vmem:[%s3144_s5 + $0xac] ss:$16 sps:$4 sm:$0xff]  }
 0x107   : > { %1455 = vmatprep.subr.bf16.mxu1 %v2314_v49  ;;  %v2361_v49 = vld [vmem:[%s3144_s5 + $0x2ac] ss:$16 sps:$4 sm:$0xff]  }
 0x109   : > { %1415 = vmatpush2.bf16.msra.mxu0 %v2316_v50  ;;  %v2356_v50 = vld [vmem:[%s3144_s5 + $0xa8] ss:$16 sps:$4 sm:$0xff]  }
 0x10a   : > { %1456 = vmatpush2.bf16.msra.mxu1 %v2317_v51  ;;  %1416 = vmatprep.subr.bf16.mxu0 %v2318_v52  ;;  %v2359_v51 = vld [vmem:[%s3144_s5 + $0x2a8] ss:$16 sps:$4 sm:$0xff]   ;;  %v2364_v52 = vld [vmem:[%s3144_s5 + $0x8c] ss:$16 sps:$4 sm:$0xff]  }
 0x10b   : > { %1457 = vmatprep.subr.bf16.mxu1 %v2320_v53  ;;  %v2367_v53 = vld [vmem:[%s3144_s5 + $0x28c] ss:$16 sps:$4 sm:$0xff]  }
 0x10d   : > { %1417 = vmatpush2.bf16.msra.mxu0 %v2322_v54  ;;  %v2362_v54 = vld [vmem:[%s3144_s5 + $0x88] ss:$16 sps:$4 sm:$0xff]  }
 0x10e   : > { %1458 = vmatpush2.bf16.msra.mxu1 %v2323_v55  ;;  %1418 = vmatprep.subr.bf16.mxu0 %v2324_v56  ;;  %v2365_v55 = vld [vmem:[%s3144_s5 + $0x288] ss:$16 sps:$4 sm:$0xff]   ;;  %v2370_v56 = vld [vmem:[%s3144_s5 + $0x6c] ss:$16 sps:$4 sm:$0xff]  }
 0x10f   : > { %1459 = vmatprep.subr.bf16.mxu1 %v2326_v57  ;;  %v2373_v57 = vld [vmem:[%s3144_s5 + $0x26c] ss:$16 sps:$4 sm:$0xff]  }
 0x111   : > { %1419 = vmatpush2.bf16.msra.mxu0 %v2328_v58  ;;  %v2368_v58 = vld [vmem:[%s3144_s5 + $0x68] ss:$16 sps:$4 sm:$0xff]  }
 0x112   : > { %1460 = vmatpush2.bf16.msra.mxu1 %v2329_v59  ;;  %1420 = vmatprep.subr.bf16.mxu0 %v2331_v60  ;;  %v2371_v59 = vld [vmem:[%s3144_s5 + $0x268] ss:$16 sps:$4 sm:$0xff]   ;;  %v2376_v60 = vld [vmem:[%s3144_s5 + $0x4c] ss:$16 sps:$4 sm:$0xff]  }
 0x113   : > { %1461 = vmatprep.subr.bf16.mxu1 %v2333_v61  ;;  %v2379_v61 = vld [vmem:[%s3144_s5 + $0x24c] ss:$16 sps:$4 sm:$0xff]  }
 0x115   : > { %1421 = vmatpush2.bf16.msra.mxu0 %v2335_v62  ;;  %v2374_v62 = vld [vmem:[%s3144_s5 + $0x48] ss:$16 sps:$4 sm:$0xff]  }
 0x116   : > { %1462 = vmatpush2.bf16.msra.mxu1 %v2336_v63  ;;  %1422 = vmatprep.subr.bf16.mxu0 %v2338_v0  ;;  %v2377_v63 = vld [vmem:[%s3144_s5 + $0x248] ss:$16 sps:$4 sm:$0xff]   ;;  %v2382_v0 = vld [vmem:[%s3144_s5 + $0x2c] ss:$16 sps:$4 sm:$0xff]  }
 0x117   : > { %1463 = vmatprep.subr.bf16.mxu1 %v2340_v1  ;;  %v2385_v1 = vld [vmem:[%s3144_s5 + $0x22c] ss:$16 sps:$4 sm:$0xff]  }
 0x119   : > { %1423 = vmatpush2.bf16.msra.mxu0 %v2342_v2  ;;  %v2380_v2 = vld [vmem:[%s3144_s5 + $0x28] ss:$16 sps:$4 sm:$0xff]  }
 0x11a   : > { %1464 = vmatpush2.bf16.msra.mxu1 %v2343_v3  ;;  %1474 = vmatprep.subr.bf16.mxu0 %v2346_v4  ;;  %v2383_v3 = vld [vmem:[%s3144_s5 + $0x228] ss:$16 sps:$4 sm:$0xff]   ;;  %v2388_v4 = vld [vmem:[%s3144_s5 + $0xc] ss:$16 sps:$4 sm:$0xff]  }
 0x11b   : > { %1515 = vmatprep.subr.bf16.mxu1 %v2349_v5  ;;  %v2391_v5 = vld [vmem:[%s3144_s5 + $0x20c] ss:$16 sps:$4 sm:$0xff]  }
 0x15f   : > { %v555_v20 = vpop.permute.xlu0 %554 }
 0x160   : > { %v579_v25 = vmul.f32 %v565_v16, %v555_v20  ;;  %v581_v26 = vmul.f32 %v572_v17, %v555_v20  ;;  %v580_v28 = vmul.f32 %v573_v21, %v555_v20  ;;  %v582_v29 = vmul.f32 %v574_v22, %v555_v20  ;;  %v2398_v16 = vld [vmem:[%s3144_s5 + $0x1c8] ss:$16 sps:$4 sm:$0xff]   ;;  %v2412_v22 = vld [vmem:[%s3144_s5 + $0x18c] ss:$16 sps:$4 sm:$0xff]  }
 0x161   : > { %v2401_v17 = vld [vmem:[%s3144_s5 + $0x3c8] ss:$16 sps:$4 sm:$0xff]  }
 0x162   : > { %v2404_v20 = vld [vmem:[%s3144_s5 + $0x1a8] ss:$16 sps:$4 sm:$0xff]  }
 0x163   : > { %v3252_v27 = vpop.permute.xlu0 %586  ;;  %v2407_v21 = vld [vmem:[%s3144_s5 + $0x3a8] ss:$16 sps:$4 sm:$0xff]  }
 0x164   : > { %v611_v30 = vmul.f32 %v597_v18, %v3252_v27  ;;  %v612_v31 = vmul.f32 %v605_v23, %v3252_v27  ;;  %v613_v32 = vmul.f32 %v604_v19, %v3252_v27  ;;  %v614_v33 = vmul.f32 %v606_v24, %v3252_v27  ;;  %v2406_v18 = vld [vmem:[%s3144_s5 + $0x1ac] ss:$16 sps:$4 sm:$0xff]   ;;  %v2410_v24 = vld [vmem:[%s3144_s5 + $0x188] ss:$16 sps:$4 sm:$0xff]  }
 0x165   : > { %v2409_v19 = vld [vmem:[%s3144_s5 + $0x3ac] ss:$16 sps:$4 sm:$0xff]  }
 0x166   : > { %v616_v34 = vadd.f32 %v612_v31, %v580_v28  ;;  %v618_v35 = vadd.f32 %v614_v33, %v582_v29  ;;  %v615_v36 = vadd.f32 %v611_v30, %v579_v25  ;;  %v617_v37 = vadd.f32 %v613_v32, %v581_v26  ;;  %v2415_v23 = vld [vmem:[%s3144_s5 + $0x38c] ss:$16 sps:$4 sm:$0xff]   ;;  %v2413_v25 = vld [vmem:[%s3144_s5 + $0x388] ss:$16 sps:$4 sm:$0xff]  }
 0x167   : > { %v2418_v26 = vld [vmem:[%s3144_s5 + $0x16c] ss:$16 sps:$4 sm:$0xff]   ;;  %v2416_v29 = vld [vmem:[%s3144_s5 + $0x168] ss:$16 sps:$4 sm:$0xff]  }
 0x168   : > { %v621_v38 = vpack.c.bf16 %v616_v34, %v616_v34  ;;  %v623_v39 = vpack.c.bf16 %v618_v35, %v618_v35  ;;  %v3260_v42 = vpack.c.bf16 %v615_v36, %v615_v36  ;;  %v3262_v43 = vpack.c.bf16 %v617_v37, %v617_v37  ;;  %v2421_v28 = vld [vmem:[%s3144_s5 + $0x36c] ss:$16 sps:$4 sm:$0xff]   ;;  %v2419_v30 = vld [vmem:[%s3144_s5 + $0x368] ss:$16 sps:$4 sm:$0xff]  }
 0x169   : > { %v2424_v31 = vld [vmem:[%s3144_s5 + $0x14c] ss:$16 sps:$4 sm:$0xff]   ;;  %v2422_v33 = vld [vmem:[%s3144_s5 + $0x148] ss:$16 sps:$4 sm:$0xff]  }
 0x16a   : > { %1424 = vmatprep.mubr.bf16.mxu0 %v621_v38  ;;  %1465 = vmatprep.mubr.bf16.mxu1 %v623_v39  ;;  %v2427_v32 = vld [vmem:[%s3144_s5 + $0x34c] ss:$16 sps:$4 sm:$0xff]   ;;  %v2425_v34 = vld [vmem:[%s3144_s5 + $0x348] ss:$16 sps:$4 sm:$0xff]  }
 0x16b   : > { %1425 = vmatmul.mubr.bf16.vlgmr.msra.gmra.mxu0 %v3260_v42  ;;  %1466 = vmatmul.mubr.bf16.vlgmr.msra.gmra.mxu1 %v3262_v43  ;;  %v2430_v35 = vld [vmem:[%s3144_s5 + $0x12c] ss:$16 sps:$4 sm:$0xff]   ;;  %v2428_v37 = vld [vmem:[%s3144_s5 + $0x128] ss:$16 sps:$4 sm:$0xff]  }
 0x16c   : > { %1475 = vmatpush1.bf16.msra.mxu0 %v2344_v40  ;;  %1516 = vmatpush1.bf16.msra.mxu1 %v2347_v41  ;;  %v2433_v36 = vld [vmem:[%s3144_s5 + $0x32c] ss:$16 sps:$4 sm:$0xff]   ;;  %v2434_v41 = vld [vmem:[%s3144_s5 + $0x108] ss:$16 sps:$4 sm:$0xff]  }
 0x16d   : > { %1506 = vmatprep.mubr.bf16.mxu0 %v621_v38  ;;  %1547 = vmatprep.mubr.bf16.mxu1 %v623_v39  ;;  %v2431_v38 = vld [vmem:[%s3144_s5 + $0x328] ss:$16 sps:$4 sm:$0xff]   ;;  %v2436_v39 = vld [vmem:[%s3144_s5 + $0x10c] ss:$16 sps:$4 sm:$0xff]  }
 0x16e   : > { %1476 = vmatprep.subr.bf16.mxu0 %v2352_v44  ;;  %1517 = vmatprep.subr.bf16.mxu1 %v2355_v45  ;;  %v2439_v40 = vld [vmem:[%s3144_s5 + $0x30c] ss:$16 sps:$4 sm:$0xff]   ;;  %v2437_v44 = vld [vmem:[%s3144_s5 + $0x308] ss:$16 sps:$4 sm:$0xff]  }
 0x170   : > { %1477 = vmatpush1.bf16.msra.mxu0 %v2350_v46  ;;  %1518 = vmatpush1.bf16.msra.mxu1 %v2353_v47 }
 0x171   : > { %1478 = vmatprep.subr.bf16.mxu0 %v2358_v48  ;;  %1519 = vmatprep.subr.bf16.mxu1 %v2361_v49 }
 0x174   : > { %1479 = vmatpush1.bf16.msra.mxu0 %v2356_v50  ;;  %1520 = vmatpush1.bf16.msra.mxu1 %v2359_v51 }
 0x175   : > { %1480 = vmatprep.subr.bf16.mxu0 %v2364_v52  ;;  %1521 = vmatprep.subr.bf16.mxu1 %v2367_v53 }
 0x178   : > { %1481 = vmatpush1.bf16.msra.mxu0 %v2362_v54  ;;  %1522 = vmatpush1.bf16.msra.mxu1 %v2365_v55 }
 0x179   : > { %1482 = vmatprep.subr.bf16.mxu0 %v2370_v56  ;;  %1523 = vmatprep.subr.bf16.mxu1 %v2373_v57 }
 0x17c   : > { %1483 = vmatpush1.bf16.msra.mxu0 %v2368_v58  ;;  %1524 = vmatpush1.bf16.msra.mxu1 %v2371_v59 }
 0x17d   : > { %1484 = vmatprep.subr.bf16.mxu0 %v2376_v60  ;;  %1525 = vmatprep.subr.bf16.mxu1 %v2379_v61 }
 0x180   : > { %1485 = vmatpush1.bf16.msra.mxu0 %v2374_v62  ;;  %1526 = vmatpush1.bf16.msra.mxu1 %v2377_v63 }
 0x181   : > { %1486 = vmatprep.subr.bf16.mxu0 %v2382_v0  ;;  %1527 = vmatprep.subr.bf16.mxu1 %v2385_v1 }
 0x184   : > { %1487 = vmatpush1.bf16.msra.mxu0 %v2380_v2  ;;  %1528 = vmatpush1.bf16.msra.mxu1 %v2383_v3  ;;  %v619_v3 = vld [vmem:[%s3166_s27] sm:$0xff] }
 0x185   : > { %1488 = vmatprep.subr.bf16.mxu0 %v2388_v4  ;;  %1529 = vmatprep.subr.bf16.mxu1 %v2391_v5 }
 0x188   : > { %1489 = vmatpush1.bf16.msra.mxu0 %v2386_v6  ;;  %1530 = vmatpush1.bf16.msra.mxu1 %v2389_v7 }
 0x189   : > { %1490 = vmatprep.subr.bf16.mxu0 %v2394_v8  ;;  %1531 = vmatprep.subr.bf16.mxu1 %v2397_v9 }
 0x18c   : > { %1491 = vmatpush2.bf16.msra.mxu0 %v2392_v11  ;;  %1532 = vmatpush2.bf16.msra.mxu1 %v2395_v12 }
 0x18d   : > { %1492 = vmatprep.subr.bf16.mxu0 %v2400_v13  ;;  %1533 = vmatprep.subr.bf16.mxu1 %v2403_v15 }
 0x190   : > { %1493 = vmatpush2.bf16.msra.mxu0 %v2398_v16  ;;  %1534 = vmatpush2.bf16.msra.mxu1 %v2401_v17 }
 0x191   : > { %1494 = vmatprep.subr.bf16.mxu0 %v2406_v18  ;;  %1535 = vmatprep.subr.bf16.mxu1 %v2409_v19 }
 0x194   : > { %1495 = vmatpush2.bf16.msra.mxu0 %v2404_v20  ;;  %1536 = vmatpush2.bf16.msra.mxu1 %v2407_v21 }
 0x195   : > { %1496 = vmatprep.subr.bf16.mxu0 %v2412_v22  ;;  %1537 = vmatprep.subr.bf16.mxu1 %v2415_v23 }
 0x198   : > { %1497 = vmatpush2.bf16.msra.mxu0 %v2410_v24  ;;  %1538 = vmatpush2.bf16.msra.mxu1 %v2413_v25 }
 0x199   : > { %1498 = vmatprep.subr.bf16.mxu0 %v2418_v26  ;;  %1539 = vmatprep.subr.bf16.mxu1 %v2421_v28 }
 0x19c   : > { %1499 = vmatpush2.bf16.msra.mxu0 %v2416_v29  ;;  %1540 = vmatpush2.bf16.msra.mxu1 %v2419_v30 }
 0x19d   : > { %1500 = vmatprep.subr.bf16.mxu0 %v2424_v31  ;;  %1541 = vmatprep.subr.bf16.mxu1 %v2427_v32 }
 0x1a0   : > { %1501 = vmatpush2.bf16.msra.mxu0 %v2422_v33  ;;  %1542 = vmatpush2.bf16.msra.mxu1 %v2425_v34 }
 0x1a1   : > { %1502 = vmatprep.subr.bf16.mxu0 %v2430_v35  ;;  %1543 = vmatprep.subr.bf16.mxu1 %v2433_v36 }
 0x1a4   : > { %1503 = vmatpush2.bf16.msra.mxu0 %v2428_v37  ;;  %1544 = vmatpush2.bf16.msra.mxu1 %v2431_v38 }
 0x1a5   : > { %1504 = vmatprep.subr.bf16.mxu0 %v2436_v39  ;;  %1545 = vmatprep.subr.bf16.mxu1 %v2439_v40 }
 0x1a8   : > { %1505 = vmatpush2.bf16.msra.mxu0 %v2434_v41  ;;  %1546 = vmatpush2.bf16.msra.mxu1 %v2437_v44 }
 0x1ab   : > { %1507 = vmatmul.mubr.bf16.vlgmr.msra.gmra.mxu0 %v3260_v42  ;;  %1548 = vmatmul.mubr.bf16.vlgmr.msra.gmra.mxu1 %v3262_v43 }
 0x22b   : > { %v1426_v45 = vpop.f32.mrf.mxu0  ;;  %v1467_v46 = vpop.f32.mrf.mxu1 }
 0x22c   : > { %v1468_v47 = vadd.f32 %v1467_v46, %v1426_v45 }
 0x22d   : > { %v1428_v48 = vpop.f32.mrf.mxu0  ;;  %v1469_v49 = vpop.f32.mrf.mxu1 }
 0x22e   : > { %v1470_v50 = vadd.f32 %v1469_v49, %v1428_v48 }
 0x22f   : > { %v1430_v51 = vpop.f32.mrf.mxu0  ;;  %v1471_v52 = vpop.f32.mrf.mxu1 }
 0x230   : > { %v1560_v53 = vcombine.low %v1468_v47, %v1470_v50 }
 0x231   : > { %v1431_v54 = vpop.f32.mrf.mxu0  ;;  %v1472_v55 = vpop.f32.mrf.mxu1 }
 0x232   : > { %v1568_v1 = vrot.slane %v1560_v53, %v3246_v14 }
 0x26b   : > { %v1508_v56 = vpop.f32.mrf.mxu0  ;;  %v1549_v57 = vpop.f32.mrf.mxu1 }
 0x26c   : > { %v1550_v42 = vadd.f32 %v1549_v57, %v1508_v56 }
 0x26d   : > { %v1510_v58 = vpop.f32.mrf.mxu0  ;;  %v1551_v59 = vpop.f32.mrf.mxu1 }
 0x26e   : > { %v1552_v60 = vadd.f32 %v1551_v59, %v1510_v58 }
 0x26f   : > { %v1512_v43 = vpop.f32.mrf.mxu0  ;;  %v1553_v61 = vpop.f32.mrf.mxu1 }
 0x270   : > { %v1561_v62 = vcombine.low %v1550_v42, %v1552_v60 }
 0x271   : > { %v1513_v63 = vpop.f32.mrf.mxu0  ;;  %v1554_v0 = vpop.f32.mrf.mxu1 }
 0x272   : > { %v1575_v2 = vrot.slane %v1561_v62, %v3246_v14 }
 0x274   : > { %v1576_v4 = vcombine.low %v1568_v1, %v1575_v2  ;;  %1583 = sbr.rel (%p2075_p9) target bundleno = 801 (0x321), region = 80 }
 0x276   : > { %v1578_v5 = vadd.f32 %v1576_v4, %v619_v3 }
 0x278   : > { %1579 = vst [vmem:[%s3166_s27] sm:$0xff] %v1578_v5 }
 0x279   : > { %v1585_v6 = vld [vmem:[%s3152_s18] sm:$0xf]  ;;  %v1589_v7 = vsub.s32 0, %v3239_v10  ;;  %v1593_v8 = vsub.s32 1, %v3239_v10  ;;  %v1597_v9 = vsub.s32 2, %v3239_v10  ;;  %v1601_v11 = vsub.s32 3, %v3239_v10 }
 0x27a   : > { %v1635_v24 = vld [vmem:[%s452_s23] sm:$0xff]  ;;  %v1636_v10 = vld [vmem:[%s443_s2] sm:$0xff]  ;;  %vm1662_vm0 = vcmask 1041408   ;;  %vm1672_vm1 = vcmask 1024  }
 0x27b   : > { %v1590_v12 = vrot.slane %v1585_v6, %v1589_v7  ;;  %v1594_v13 = vrot.slane %v1585_v6, %v1593_v8  ;;  %v1598_v15 = vrot.slane %v1585_v6, %v1597_v9  ;;  %v1602_v16 = vrot.slane %v1585_v6, %v1601_v11 }
 0x27c   : > { %v1637_v29 = vsub.f32 %v1635_v24, %v1636_v10 }
 0x27d   : > { %v1607_v17 = vmul.f32 %v1590_v12, %v3252_v27  ;;  %v1608_v18 = vmul.f32 %v1594_v13, %v3252_v27  ;;  %v1609_v19 = vmul.f32 %v1598_v15, %v3252_v27  ;;  %v1610_v20 = vmul.f32 %v1602_v16, %v3252_v27 }
 0x27f   : > { %v1615_v21 = vcombine.low %v1607_v17, %v1608_v18  ;;  %v1616_v22 = vcombine.low %v1609_v19, %v1610_v20  ;;  %v1584_v26 = vld [vmem:[%s3166_s27] sm:$0xff] }
 0x281   : > { %v1623_v23 = vrot.slane %v1615_v21, %v3246_v14  ;;  %v1630_v25 = vrot.slane %v1616_v22, %v3246_v14 }
 0x283   : > { %v1631_v28 = vcombine.low %v1623_v23, %v1630_v25 }
 0x285   : > { %v1633_v30 = vadd.f32 %v1631_v28, %v1584_v26 }
 0x287   : > { %1634 = vst [vmem:[%s3166_s27] sm:$0xff] %v1633_v30  ;;  %v1638_v31 = vsub.f32 %v1633_v30, %v1637_v29 }
 0x289   : > { %v1639_v32 = vmul.f32 %v1638_v31, %v1638_v31 }
 0x28b   : > { %v1641_v27 = vcombine.high %v1639_v32, %v1639_v32  ;;  %v1648_v33 = vrot.slane %v1639_v32, %v3246_v14 }
 0x28d   : > { %v1655_v34 = vrot.slane %v1641_v27, %v3246_v14  ;;  %v1656_v35 = vcombine.high %v1648_v33, %v1648_v33  ;;  %v1663_v36 = vsel %vm1662_vm0, %v1648_v33, 0.0 }
 0x28f   : > { %v1657_v37 = vcombine.high %v1655_v34, %v1655_v34  ;;  %v1664_v38 = vsel %vm1662_vm0, %v1656_v35, 0.0  ;;  %v1666_v39 = vsel %vm1662_vm0, %v1655_v34, 0.0 }
 0x290   : > { %v1665_v40 = vadd.f32 %v1664_v38, %v1663_v36 }
 0x291   : > { %v1668_v41 = vsel %vm1662_vm0, %v1657_v37, 0.0 }
 0x292   : > { %v1667_v44 = vadd.f32 %v1666_v39, %v1665_v40 }
 0x294   : > { %v1669_v45 = vadd.f32 %v1668_v41, %v1667_v44 }
 0x296   : > { %1670 = vadd.xlane.f32.xlu0 %v1669_v45 }
 0x31f   : > { %v1671_v46 = vpop.xlane.xlu0 %1670 }
 0x320   : > { %1673 = vst.msk [vmem:[%s3163_s10] sm:$0x3] %vm1672_vm1, %v1671_v46 }
 0x321 PF: > { %s3527_s15 = sld [smem:[#allocation27_spill]]  ;;  %s1693_s11 = sshll.u32 %s3166_s27, 4  ;;  %s1694_s11 = int_to_ptr.vmem [resolvable:$true] %s1693_s11 }
 0x322   : > { %s3528_s8 = sld [smem:[#allocation37_spill]]  ;;  %s1675_s9 = scalar_lea.sflag [#allocation4], %s3128_s3 }
 0x323   : > { %s3529_s26 = sld [smem:[#allocation45_spill]]  ;;  %s2608_s5 = scalar_lea.vmem %s1694_s11, 128 }
 0x324   : > { %p2609_p10 = scmp.ne.s32.totalorder %s1694_s11, %s2608_s5  ;;  %s2786_s20 = smov [#allocation13]  }
 0x325   : > { %s2612_s4 = sshll.u32 %s2786_s20, 4  ;;  %s2613_s4 = int_to_ptr.vmem [resolvable:$false] %s2612_s4 }
 0x326   : > { %s2614_s18 = scalar_lea.vmem %s2613_s4, 256  ;;  %p2615_p7 = scmp.lt.s32.totalorder %s1694_s11, %s2613_s4 }
 0x327   : > { %s2087_s28 = sshll.u32 %s3527_s15, 7  ;;  %p2616_p2 = scmp.lt.s32.totalorder %s2614_s18, %s2608_s5 }
 0x328   : > { %p3530_p4 = scmp.ne.s32.totalorder %s3528_s8, 0 }
 0x329   : > { %s1691_s7 = scalar_lea.hbm %s3529_s26, %s2087_s28  ;;  %p2617_p8 = por %p2616_p2, %p2615_p7 }
 0x32a   : > { %p2610_p13 = pnand %p2609_p10, %p3530_p4 }
 0x32c   : > { %p2611_p3 = pneg %p2610_p13 }
 0x32e   : > { %p2618_p5 = pnand %p2617_p8, %p2611_p3 }
 0x330   : > { %2621 = shalt.err (!%p2618_p5)
}
 0x331   : > { %s2622_s30 = scalar_lea.hbm %s1691_s7, 128  ;;  %s2626_s0 = scalar_lea.hbm %s3529_s26, 256 }
 0x332   : > { %p2623_p12 = scmp.ne.s32.totalorder %s1691_s7, %s2622_s30  ;;  %p2627_p1 = scmp.lt.s32.totalorder %s1691_s7, %s3529_s26 }
 0x333   : > { %p2628_p11 = scmp.lt.s32.totalorder %s2626_s0, %s2622_s30 }
 0x334   : > { %p2624_p0 = pnand %p2623_p12, %p3530_p4 }
 0x335   : > { %p2629_p9 = por %p2628_p11, %p2627_p1 }
 0x336   : > { %p2625_p6 = pneg %p2624_p0 }
 0x338   : > { %p2630_p10 = pnand %p2629_p9, %p2625_p6 }
 0x33a   : > { %2633 = shalt.err (!%p2630_p10)
}
 0x33b   : > { %2100 = dma.vmem_to_hbm [thread:$0]  (%p3530_p4), %s1694_s11, 128, %s1691_s7, %s1675_s9  }
 0x33c PF: > { %s3531_s10 = sld [smem:[#allocation28_spill]] }
 0x33d   : > { %s3532_s27 = sld [smem:[#allocation22_spill]] }
 0x33e   : > { %s3533_s21 = sld [smem:[#allocation38_spill]] }
 0x342   : > { %p2126_p13 = scmp.ge.s32.totalorder %s3531_s10, 2 }
 0x343   : > { %s1708_s22 = sand.u32 1, %s3532_s27  }
 0x344   : > { %p3534_p3 = scmp.ne.s32.totalorder %s3533_s21, 0  ;;  %s1709_s24 = scalar_lea.sflag [#allocation4], %s1708_s22 }
 0x346   : > { %p2122_p7 = pnand %p2126_p13, %p3534_p3 }
 0x348   : > { %p2123_p2 = pneg %p2122_p7 }
 0x34a   : > { %2715 = dma.done.wait (%p2123_p2), %s1709_s24, 128  }
 0x34b   : > { %2717 = vsyncadd (%p2123_p2), %s1709_s24, 4294967168  ;;  %s34_s18 = sadd.s32 1, %s3531_s10   ;;  %s3536_s27 = sld [smem:[#allocation21_spill]] }
 0x34c   : > { %p3376_p8 = scmp.ge.s32.totalorder %s34_s18, 6   ;;  %s3537_s25 = sld [smem:[#allocation33_spill]] }
 0x34d   : > { %s3538_s30 = sld [smem:[#allocation23_spill]]  ;;  %s3545_s28 = smov %s2728_s29 }
 0x34e   : > { %s3539_s9 = sld [smem:[#allocation24_spill]]  ;;  %s3547_s12 = smov %s2752_s13 }
 0x34f   : > { %s3540_s10 = sld [smem:[#allocation35_spill]]  ;;  %s3549_s14 = smov %s2764_s16 }
 0x350   : > { %s3541_s11 = sld [smem:[#allocation25_spill]] }
 0x351   : > { %s3542_s15 = sld [smem:[#allocation31_spill]] }
 0x352   : > { %s3543_s8 = sld [smem:[#allocation29_spill]]  ;;  %s3546_s29 = smov %s3537_s25 }
 0x353   : > { %s3544_s2 = sld [smem:[#allocation30_spill]] }
 0x355   :  { %33 = sbr.rel (!%p3376_p8) target bundleno = 25 (0x19), region = 174 }
 0x357   : > { %s3548_s13 = smov %s3542_s15  ;;  %s3550_s15 = smov %s2768_s17 }
 0x358   : > { %s3551_s16 = smov %s3543_s8 }
 0x359   : > { %s3552_s17 = smov %s3544_s2 }
 0x35a   :  { %1721 = vsyncpa [#allocation3], 1 }
 0x35b   :  { %1723 = vsyncpa [#allocation3 + $0x1], 1 }
 0x35c   :  { %1724 = vsyncpa [#allocation6], 1 }
 0x35d   :  { %1726 = vsyncpa [#allocation6 + $0x1], 1 }
 0x35e   :  { %1727 = vsyncpa [#allocation9], 1 }
 0x35f   :  { %1729 = vsyncpa [#allocation9 + $0x1], 1 }
 0x360   :  { %1730 = vsyncpa [#allocation12], 1 }
 0x361   :  { %1732 = vsyncpa [#allocation12 + $0x1], 1 }
 0x362   :  { %1733 = vsyncpa [#allocation4], 1 }
 0x363   :  { %1735 = vsyncpa [#allocation4 + $0x1], 1 }

</bundles_post_ra>
